<compile_context>
chip_gen: v5e
topology: v5e:2x2
jax: 0.10.0
libtpu: 0.0.40
codegen_flags: <defaults>
</compile_context>

<pallas_src>
import jax
import jax.numpy as jnp
from jax.experimental import pallas as pl
from jax.experimental.pallas import tpu as pltpu


def _round_up(x, m):
    return ((x + m - 1) // m) * m


def _mac_crossbar_kernel_single(x_ref, w_ref, o_ref):
    """grid == (1,1,1): one MXU matmul, no reduction loop, no predicates."""
    o_ref[...] = jnp.dot(
        x_ref[...], w_ref[...], preferred_element_type=jnp.float32
    )


def _mac_crossbar_kernel_tiled(x_ref, w_ref, o_ref):
    """Tiled matmul. Output block index is k-invariant and o_ref is f32, so the
    output tile stays VMEM-resident across the reduction axis: accumulate
    directly into it (no scratch accumulator needed)."""
    @pl.when(pl.program_id(2) == 0)
    def _():
        o_ref[...] = jnp.zeros_like(o_ref)

    o_ref[...] += jnp.dot(
        x_ref[...], w_ref[...], preferred_element_type=jnp.float32
    )


def mac_crossbar(x, weight, *, tm=None, tn=None, tk=None, use_bf16=False):
    """output = x @ weight (MAC_Crossbar.forward) computed on the TPU MXU."""
    M, K = x.shape
    K2, N = weight.shape
    assert K == K2, "dim_in mismatch"

    out_dtype = jnp.float32

    if use_bf16:
        # bf16 operands + f32 accumulation: ~2x MXU throughput and half the
        # HBM traffic on v6e/v7x; acceptable for N(0, W_std) crossbar MVMs.
        x = x.astype(jnp.bfloat16)
        weight = weight.astype(jnp.bfloat16)

    # Bounded, TPU-friendly default tiles (sublane=8, lane=128 alignment).
    # Small dims collapse to a single lane/sublane-aligned block.
    def pick(dim, pref, align):
        return _round_up(dim, align) if dim <= pref else pref

    tm = pick(M, 256, 8) if tm is None else tm
    tn = pick(N, 256, 128) if tn is None else tn
    tk = pick(K, 512, 128) if tk is None else tk

    # Zero-pad operands so every dimension is an exact multiple of its tile.
    # Padding K with zeros does not change the result; padded M/N rows/cols
    # are sliced off afterwards. This also makes the output lane-dense.
    Mp, Kp, Np = _round_up(M, tm), _round_up(K, tk), _round_up(N, tn)
    if (Mp, Kp) != (M, K):
        x = jnp.pad(x, ((0, Mp - M), (0, Kp - K)))
    if (Kp, Np) != (K, N):
        weight = jnp.pad(weight, ((0, Kp - K), (0, Np - N)))

    grid = (Mp // tm, Np // tn, Kp // tk)
    single_step = grid == (1, 1, 1)
    kernel = _mac_crossbar_kernel_single if single_step else _mac_crossbar_kernel_tiled

    # VMEM budget: double-buffered input tiles + double-buffered f32 output
    # tile, with 2x headroom. Clamp to [16 MiB, 64 MiB] (v7x physical ceiling).
    in_bytes = jnp.dtype(x.dtype).itemsize
    vmem_est = 2 * (tm * tk + tk * tn) * in_bytes + 2 * tm * tn * 4
    vmem_limit = int(min(max(2 * vmem_est, 16 << 20), 64 << 20))

    out = pl.pallas_call(
        kernel,
        out_shape=jax.ShapeDtypeStruct((Mp, Np), out_dtype),
        grid_spec=pltpu.PrefetchScalarGridSpec(
            num_scalar_prefetch=0,
            grid=grid,
            in_specs=[
                pl.BlockSpec((tm, tk), lambda i, j, k: (i, k)),
                pl.BlockSpec((tk, tn), lambda i, j, k: (k, j)),
            ],
            out_specs=pl.BlockSpec((tm, tn), lambda i, j, k: (i, j)),
        ),
        compiler_params=pltpu.CompilerParams(
            dimension_semantics=("parallel", "parallel", "arbitrary"),
            vmem_limit_bytes=vmem_limit,
        ),
    )(x, weight)

    if (Mp, Np) != (M, N):
        out = out[:M, :N]
    return out


if __name__ == "__main__":
    # --- Small config consistent with MAC_Crossbar(dim_in, dim_out, W_std) ---
    batch, dim_in, dim_out = 8, 32, 32
    W_std = 0.05

    key = jax.random.PRNGKey(0)
    kx, kw, kx2, kw2 = jax.random.split(key, 4)

    # Deterministic "parameter" init: weight ~ N(0, W_std), as in __init__.
    weight = W_std * jax.random.normal(kw, (dim_in, dim_out), dtype=jnp.float32)
    x = jax.random.normal(kx, (batch, dim_in), dtype=jnp.float32)

    out = jax.block_until_ready(mac_crossbar(x, weight))
    ref = x @ weight
    assert out.shape == (batch, dim_out)
    assert jnp.allclose(out, ref, atol=1e-4, rtol=1e-4)

    # --- Larger shape to exercise the tiled / k-accumulation path ---
    M2, K2, N2 = 16, 1024, 256
    w2 = W_std * jax.random.normal(kw2, (K2, N2), dtype=jnp.float32)
    x2 = jax.random.normal(kx2, (M2, K2), dtype=jnp.float32)

    out2 = jax.block_until_ready(mac_crossbar(x2, w2))
    ref2 = x2 @ w2
    assert out2.shape == (M2, N2)
    assert jnp.allclose(out2, ref2, atol=1e-3, rtol=1e-3)

    print("KERNEL_OK")
</pallas_src>

<mosaic_0001>
module attributes {stable_mosaic.version = 11 : i64} {
  func.func @_mac_crossbar_kernel_single(%arg0: i32, %arg1: i32, %arg2: i32, %arg3: memref<8x128xf32, #tpu.memory_space<vmem>>, %arg4: memref<128x128xf32, #tpu.memory_space<vmem>>, %arg5: memref<8x128xf32, #tpu.memory_space<vmem>>) attributes {dimension_semantics = [#tpu.dimension_semantics<parallel>, #tpu.dimension_semantics<parallel>, #tpu.dimension_semantics<arbitrary>], iteration_bounds = array<i64: 1, 1, 1>, scalar_prefetch = 0 : i64, scratch_operands = 0 : i64, tpu.core_type = #tpu.core_type<tc>, window_params = [{transform_indices = @transform_0, window_bounds = array<i64: 8, 128>}, {transform_indices = @transform_1, window_bounds = array<i64: 128, 128>}, {transform_indices = @transform_2, window_bounds = array<i64: 8, 128>}]} {
    %c0 = arith.constant 0 : index
    %c0_0 = arith.constant 0 : index
    %0 = vector.load %arg3[%c0, %c0_0] : memref<8x128xf32, #tpu.memory_space<vmem>>, vector<8x128xf32>
    %c0_1 = arith.constant 0 : index
    %c0_2 = arith.constant 0 : index
    %1 = vector.load %arg4[%c0_1, %c0_2] : memref<128x128xf32, #tpu.memory_space<vmem>>, vector<128x128xf32>
    %cst = arith.constant dense<0.000000e+00> : vector<8x128xf32>
    %2 = tpu.matmul %0, %1, %cst {dimension_numbers = #tpu.dot_dimension_numbers<[1], [0], [0], [1], [0, 0, 1, 1], [], []>} : vector<8x128xf32>, vector<128x128xf32>, vector<8x128xf32> -> vector<8x128xf32>
    %c0_3 = arith.constant 0 : index
    %c0_4 = arith.constant 0 : index
    %3 = vector.load %arg5[%c0_3, %c0_4] : memref<8x128xf32, #tpu.memory_space<vmem>>, vector<8x128xf32>
    tpu.vector_store %arg5[%c0_3, %c0_4], %2 {strides = array<i32>} : memref<8x128xf32, #tpu.memory_space<vmem>>, vector<8x128xf32>,
    return
  }
  func.func @transform_0(%arg0: i32, %arg1: i32, %arg2: i32) -> (i32, i32) {
    %c0_i32 = arith.constant 0 : i32
    return %arg0, %arg2 : i32, i32
  }
  func.func @transform_1(%arg0: i32, %arg1: i32, %arg2: i32) -> (i32, i32) {
    %c0_i32 = arith.constant 0 : i32
    return %arg2, %arg1 : i32, i32
  }
  func.func @transform_2(%arg0: i32, %arg1: i32, %arg2: i32) -> (i32, i32) {
    %c0_i32 = arith.constant 0 : i32
    return %arg0, %arg1 : i32, i32
  }
}

</mosaic_0001>

<bundles_post_ra>
// kernel: tpu_custom_call.1
= control target key start
LH: loop header
LB: loop body
LE: loop exit
PB: predicated region body
PF: predicated region fallthrough
CT: control target
= control target key end

     0   :  { %7 = vsyncpa [#allocation3], 0  ;;  %s210_s0 = inlined_call_operand.hbm [shape: f32[8,128], index: 0, kind: input, shape index: {}]   ;;  %s211_s1 = inlined_call_operand.hbm [shape: f32[128,128], index: 1, kind: input, shape index: {}]   ;;  %s212_s2 = inlined_call_operand.hbm [shape: f32[8,128], index: 2, kind: output, shape index: {}]  }
   0x1   :  { %8 = vsyncpa [#allocation6], 0 }
   0x2   :  { %9 = vsyncpa [#allocation4], 0  ;;  %s15_s11 = sshll.u32 %s210_s0, 4  ;;  %s181_s12 = smov [#allocation2]   ;;  %s16_s11 = int_to_ptr.hbm [resolvable:$true] %s15_s11 }
   0x3   :  { %s17_s13 = sshll.u32 %s181_s12, 4  ;;  %s25_s16 = sshll.u32 %s211_s1, 4  ;;  %s18_s13 = int_to_ptr.vmem [resolvable:$true] %s17_s13  ;;  %s26_s16 = int_to_ptr.hbm [resolvable:$true] %s25_s16 }
   0x4   :  { %20 = dma.hbm_to_vmem [thread:$0]  %s16_s11, 128, %s18_s13, [#allocation3]  }
   0x5   :  { %s182_s17 = smov [#allocation5]   ;;  %s183_s19 = smov 128  }
   0x6   :  { %s27_s18 = sshll.u32 %s182_s17, 4  ;;  %s184_s20 = smov 8   ;;  %s28_s18 = int_to_ptr.vmem [resolvable:$true] %s27_s18 }
   0x7   :  { %33 = dma.hbm_to_vmem [thread:$0]  %s26_s16, 2048, %s28_s18, [#allocation6], %s183_s19, %s183_s19, %s184_s20  }
   0x8   :  { %175 = dma.done.wait [#allocation3], 128  }
   0x9   :  { %176 = vsyncadd [#allocation3], 4294967168 }
   0xa   :  { %177 = dma.done.wait [#allocation6], 2048  }
   0xb   :  { %178 = vsyncadd [#allocation6], 4294965248  ;;  %v58_v0 = vld [vmem:[#allocation5 + $0x78] sm:$0xff]  ;;  %v57_v1 = vld [vmem:[#allocation5 + $0x70] sm:$0xff]  ;;  %s185_s0 = smov [#allocation7]   ;;  %s87_s23 = sshll.u32 %s212_s2, 4  ;;  %s88_s23 = int_to_ptr.hbm [resolvable:$true] %s87_s23 }
   0xc   :  { %59 = vmatpush.msra.mxu0 %v58_v0  ;;  %v56_v2 = vld [vmem:[#allocation5 + $0x68] sm:$0xff]  ;;  %v55_v3 = vld [vmem:[#allocation5 + $0x60] sm:$0xff]  ;;  %v54_v4 = vld [vmem:[#allocation5 + $0x58] sm:$0xff]  ;;  %s85_s1 = sshll.u32 %s185_s0, 4  ;;  %s86_s1 = int_to_ptr.vmem [resolvable:$true] %s85_s1 }
   0xd   :  { %v53_v5 = vld [vmem:[#allocation5 + $0x50] sm:$0xff]  ;;  %v52_v6 = vld [vmem:[#allocation5 + $0x48] sm:$0xff]  ;;  %v51_v7 = vld [vmem:[#allocation5 + $0x40] sm:$0xff] }
   0xe   :  { %60 = vmatpush.msra.mxu0 %v57_v1  ;;  %v50_v8 = vld [vmem:[#allocation5 + $0x38] sm:$0xff]  ;;  %v49_v9 = vld [vmem:[#allocation5 + $0x30] sm:$0xff]  ;;  %v48_v10 = vld [vmem:[#allocation5 + $0x28] sm:$0xff] }
   0xf   :  { %v47_v11 = vld [vmem:[#allocation5 + $0x20] sm:$0xff]  ;;  %v46_v12 = vld [vmem:[#allocation5 + $0x18] sm:$0xff]  ;;  %v45_v13 = vld [vmem:[#allocation5 + $0x10] sm:$0xff] }
  0x10   :  { %61 = vmatpush.msra.mxu0 %v56_v2  ;;  %v44_v14 = vld [vmem:[#allocation5 + $0x8] sm:$0xff]  ;;  %v43_v15 = vld [vmem:[#allocation5] sm:$0xff]  ;;  %v42_v16 = vld [vmem:[#allocation2] sm:$0xff] }
  0x12   :  { %62 = vmatpush.msra.mxu0 %v55_v3 }
  0x14   :  { %63 = vmatpush.msra.mxu0 %v54_v4 }
  0x16   :  { %64 = vmatpush.msra.mxu0 %v53_v5 }
  0x18   :  { %65 = vmatpush.msra.mxu0 %v52_v6 }
  0x1a   :  { %66 = vmatpush.msra.mxu0 %v51_v7 }
  0x1c   :  { %67 = vmatpush.msra.mxu0 %v50_v8 }
  0x1e   :  { %68 = vmatpush.msra.mxu0 %v49_v9 }
  0x20   :  { %69 = vmatpush.msra.mxu0 %v48_v10 }
  0x22   :  { %70 = vmatpush.msra.mxu0 %v47_v11 }
  0x24   :  { %71 = vmatpush.msra.mxu0 %v46_v12 }
  0x26   :  { %72 = vmatpush.msra.mxu0 %v45_v13 }
  0x28   :  { %73 = vmatpush.msra.mxu0 %v44_v14 }
  0x2a   :  { %74 = vmatpush.msra.mxu0 %v43_v15 }
  0x2b   :  { %75 = vmatmul.f32.vlgmr.msra.gmra.mxu0 %v42_v16 }
  0xa8   :  { %v76_v17 = vpop.f32.mrf.mxu0 }
  0xa9   :  { %79 = vst [vmem:[#allocation7] sm:$0xff] %v76_v17 }
  0xaa   :  { %90 = dma.vmem_to_hbm [thread:$0]  %s86_s1, 128, %s88_s23, [#allocation4]  }
  0xab   :  { %179 = dma.done.wait [#allocation4], 128  }
  0xac   :  { %180 = vsyncadd [#allocation4], 4294967168 }
  0xad   :  { %95 = vsyncpa [#allocation3], 1 }
  0xae   :  { %96 = vsyncpa [#allocation6], 1 }
  0xaf   :  { %97 = vsyncpa [#allocation4], 1 }

</bundles_post_ra>
